<compile_context>
chip_gen: v5e
topology: v5e:2x2
jax: 0.10.0
libtpu: 0.0.40
codegen_flags: <defaults>
</compile_context>

<pallas_src>
import jax
import jax.numpy as jnp
from jax import lax
from jax.experimental import pallas as pl
from jax.experimental.pallas import tpu as pltpu

LANE = 128
_NEG_INF = float("-inf")


def _make_pool_kernel(c_tile, hw, ts, lane, nk, needs_mask, unroll):
    """Per-(batch, channel-tile) spatial sum/max pooling over the nK axis."""
    num_sub = ts // lane          # 128-lane chunks per spatial tile
    inv_hw = 1.0 / float(hw)

    if needs_mask:
        rem_total = hw - (nk - 1) * ts          # valid elems in the last tile
        last_full = rem_total // lane           # full chunks in the last tile
        last_rem = rem_total - last_full * lane  # ragged tail width (static)
    else:
        last_full = num_sub
        last_rem = 0

    def kernel(x_ref, o_ref, sum_acc, max_acc):
        # x_ref : (1, c_tile, ts)     spatial tile of the flattened input
        # o_ref : (1, 1, 2, c_tile)   [avg ; max] pooled rows (lane-dense)
        # sum_acc / max_acc : (c_tile, lane) f32 scratch accumulators
        k = pl.program_id(2)

        @pl.when(k == 0)
        def _init():
            sum_acc[...] = jnp.zeros_like(sum_acc)
            max_acc[...] = jnp.full_like(max_acc, _NEG_INF)

        def chunk(j, carry):
            s, m = carry
            off = pl.multiple_of(j * lane, lane)
            v = x_ref[0, :, pl.ds(off, lane)].astype(jnp.float32)
            return s + v, jnp.maximum(m, v)

        zero = jnp.zeros((c_tile, lane), jnp.float32)
        ninf = jnp.full((c_tile, lane), _NEG_INF, jnp.float32)

        if not needs_mask:
            # Static trip count: modest unroll keeps the LLO scheduler fed
            # without blowing vreg live ranges.
            s, m = lax.fori_loop(0, num_sub, chunk, (zero, ninf),
                                 unroll=unroll)
        else:
            # Dynamic trip count: on the last spatial step only the fully
            # valid chunks are visited, so the fast path never touches the
            # garbage (OOB-of-hw) region and needs no masking.
            nf = jnp.where(k == nk - 1, last_full, num_sub)
            s, m = lax.fori_loop(0, nf, chunk, (zero, ninf))

        # Exactly one scratch read-modify-write per grid step.
        sum_acc[...] = sum_acc[...] + s
        max_acc[...] = jnp.maximum(max_acc[...], m)

        if needs_mask and last_rem > 0:
            # Ragged tail of the very last spatial tile: masked, runs once.
            @pl.when(k == nk - 1)
            def _tail():
                v = x_ref[0, :, pl.ds(last_full * lane, lane)].astype(jnp.float32)
                col = lax.broadcasted_iota(jnp.int32, (c_tile, lane), 1)
                valid = col < last_rem
                sum_acc[...] = sum_acc[...] + jnp.where(valid, v, 0.0)
                max_acc[...] = jnp.maximum(max_acc[...],
                                           jnp.where(valid, v, _NEG_INF))

        @pl.when(k == nk - 1)
        def _finalize():
            # Single cross-lane (XLU) reduce per accumulator, then one
            # lane-dense store (last dim = c_tile).
            avg = jnp.sum(sum_acc[...], axis=-1, keepdims=True) * inv_hw  # [c,1]
            mx = jnp.max(max_acc[...], axis=-1, keepdims=True)           # [c,1]
            pooled = jnp.concatenate([avg, mx], axis=1)                  # [c,2]
            o_ref[0, 0] = pooled.T.astype(o_ref.dtype)                   # [2,c]

    return kernel


def channel_attention(x, w1, w2):
    """ChannelAttentionModule forward.

    x : [B, C, H, W]; w1 : [hidden, C] (conv1 1x1 weight, bias=False, squeezed);
    w2 : [C, hidden] (conv2 1x1 weight, squeezed).
    Returns sigmoid(MLP(avgpool(x)) + MLP(maxpool(x))) with shape [B, C, 1, 1].
    """
    B, C, H, W = x.shape
    hw = H * W
    x_flat = x.reshape(B, C, hw)
    itemsize = jnp.dtype(x.dtype).itemsize

    # --- channel tile: exact divisor of C (no OOB blocks in the channel
    #     axis), <=64 rows so the in-vreg accumulators stay small, and it
    #     gives a second "parallel" grid axis for megacore when B == 1.
    if C <= 64:
        c_tile, n_c = C, 1
    else:
        c_tile, n_c = C, 1  # fallback: no clean divisor (rare; may spill)
        for d in range(64, 0, -8):
            if C % d == 0:
                c_tile, n_c = d, C // d
                break

    # --- generation-aware spatial tile sizing.
    try:
        vmem_cap = int(pltpu.get_tpu_info().vmem_capacity_bytes)
    except Exception:
        vmem_cap = 64 * 1024 * 1024
    if vmem_cap >= 100 * 1024 * 1024:      # v5e / v6e: 128 MiB VMEM
        tile_budget = 16 * 1024 * 1024
    else:                                  # v7x: 64 MiB VMEM (or unknown)
        tile_budget = 8 * 1024 * 1024

    if hw >= LANE:
        max_by_vmem = max(LANE,
                          (tile_budget // (c_tile * itemsize)) // LANE * LANE)
        ts = min((hw // LANE) * LANE, max_by_vmem)
        lane = LANE
    else:
        ts = hw
        lane = hw
    nk = -(-hw // ts)
    needs_mask = (hw % ts) != 0
    num_sub = ts // lane
    unroll = max(1, min(8, num_sub, 256 // max(c_tile, 1)))

    # VMEM limit: double-buffered x tile + accumulators + small output + slack.
    x_tile_bytes = c_tile * ts * itemsize
    acc_bytes = 2 * c_tile * lane * 4
    vmem_limit = 2 * x_tile_bytes + acc_bytes + (4 << 20)
    vmem_limit = int(max(16 << 20, min(vmem_limit, (vmem_cap * 3) // 4)))

    kernel = _make_pool_kernel(c_tile, hw, ts, lane, nk, needs_mask, unroll)

    pooled = pl.pallas_call(
        kernel,
        out_shape=jax.ShapeDtypeStruct((B, n_c, 2, c_tile), jnp.float32),
        grid_spec=pltpu.PrefetchScalarGridSpec(
            num_scalar_prefetch=0,
            grid=(B, n_c, nk),                 # spatial reduction axis last
            in_specs=[
                pl.BlockSpec((1, c_tile, ts), lambda b, c, k: (b, c, k)),
            ],
            out_specs=pl.BlockSpec((1, 1, 2, c_tile),
                                   lambda b, c, k: (b, c, 0, 0)),
            scratch_shapes=[
                pltpu.VMEM((c_tile, lane), jnp.float32),   # running sum
                pltpu.VMEM((c_tile, lane), jnp.float32),   # running max
            ],
        ),
        compiler_params=pltpu.CompilerParams(
            dimension_semantics=("parallel", "parallel", "arbitrary"),
            vmem_limit_bytes=vmem_limit,
        ),
    )(x_flat)

    # Re-assemble pooled [avg ; max] vectors to [B, 2, C] (tiny).
    pooled = pooled.transpose(0, 2, 1, 3).reshape(B, 2, C)

    # Shared MLP (two 1x1 convs, bias=False) + ReLU, add, sigmoid — done in
    # plain XLA: sane batched matmul shapes, no weight residency in VMEM.
    w1f = w1.astype(jnp.float32)
    w2f = w2.astype(jnp.float32)
    h = jnp.maximum(jnp.einsum('bpc,hc->bph', pooled, w1f), 0.0)  # conv1+ReLU
    y = jnp.einsum('bph,ch->bpc', h, w2f)                         # conv2
    z = y[:, 0, :] + y[:, 1, :]                                   # avg + max paths
    att = jax.nn.sigmoid(z)
    return att.astype(x.dtype).reshape(B, C, 1, 1)


def _reference(x, w1, w2):
    # Pure-JAX reference mirroring the PyTorch forward.
    xf = x.astype(jnp.float32)
    avg = jnp.mean(xf, axis=(2, 3))  # [B, C]
    mx = jnp.max(xf, axis=(2, 3))    # [B, C]

    def mlp(v):
        h = jnp.maximum(v @ w1.astype(jnp.float32).T, 0.0)
        return h @ w2.astype(jnp.float32).T

    z = mlp(avg) + mlp(mx)
    out = 1.0 / (1.0 + jnp.exp(-z))
    return out.astype(x.dtype)[:, :, None, None]


if __name__ == "__main__":
    key = jax.random.PRNGKey(0)

    ok = True
    # Case 1: even shapes (no ragged spatial tail).
    # Case 2: ragged spatial size (exercises the masked-tail / dynamic path).
    for (B, C, H, W) in [(2, 16, 16, 16), (1, 32, 17, 19)]:
        ratio = 8
        hidden = max(1, C // ratio)
        key, kx, k1, k2 = jax.random.split(key, 4)
        x = jax.random.normal(kx, (B, C, H, W), dtype=jnp.float32)
        # PyTorch shapes: conv1 weight [hidden, C, 1, 1], conv2 [C, hidden, 1, 1],
        # squeezed to 2D (bias=False).
        w1 = jax.random.normal(k1, (hidden, C), dtype=jnp.float32) * 0.1
        w2 = jax.random.normal(k2, (C, hidden), dtype=jnp.float32) * 0.1

        out = channel_attention(x, w1, w2)
        out = jax.block_until_ready(out)

        ref = _reference(x, w1, w2)
        ok &= (out.shape == (B, C, 1, 1))
        ok &= bool(jnp.allclose(out, ref, atol=1e-5, rtol=1e-5))

    assert ok
    print("KERNEL_OK")
</pallas_src>

<mosaic_0001>
module attributes {stable_mosaic.version = 11 : i64} {
  func.func @kernel(%arg0: i32, %arg1: i32, %arg2: i32, %arg3: memref<1x16x256xf32, #tpu.memory_space<vmem>>, %arg4: memref<1x1x2x16xf32, #tpu.memory_space<vmem>>, %arg5: memref<16x128xf32, #tpu.memory_space<vmem>>, %arg6: memref<16x128xf32, #tpu.memory_space<vmem>>) attributes {dimension_semantics = [#tpu.dimension_semantics<parallel>, #tpu.dimension_semantics<parallel>, #tpu.dimension_semantics<arbitrary>], iteration_bounds = array<i64: 2, 1, 1>, scalar_prefetch = 0 : i64, scratch_operands = 2 : i64, tpu.core_type = #tpu.core_type<tc>, window_params = [{transform_indices = @transform_0, window_bounds = array<i64: 1, 16, 256>}, {transform_indices = @transform_1, window_bounds = array<i64: 1, 1, 2, 16>}]} {
    %c0_i32 = arith.constant 0 : i32
    %0 = arith.cmpi eq, %arg2, %c0_i32 : i32
    %1 = arith.extui %0 : i1 to i32
    %c0_i32_0 = arith.constant 0 : i32
    %2 = arith.cmpi ne, %1, %c0_i32_0 : i32
    scf.if %2 {
      %cst_17 = arith.constant 0.000000e+00 : f32
      %28 = vector.broadcast %cst_17 : f32 to vector<16x128xf32>
      %c0_18 = arith.constant 0 : index
      %c0_19 = arith.constant 0 : index
      %29 = vector.load %arg5[%c0_18, %c0_19] : memref<16x128xf32, #tpu.memory_space<vmem>>, vector<16x128xf32>
      tpu.vector_store %arg5[%c0_18, %c0_19], %28 {strides = array<i32>} : memref<16x128xf32, #tpu.memory_space<vmem>>, vector<16x128xf32>,
      %cst_20 = arith.constant 0xFF800000 : f32
      %30 = vector.broadcast %cst_20 : f32 to vector<16x128xf32>
      %c0_21 = arith.constant 0 : index
      %c0_22 = arith.constant 0 : index
      %31 = vector.load %arg6[%c0_21, %c0_22] : memref<16x128xf32, #tpu.memory_space<vmem>>, vector<16x128xf32>
      tpu.vector_store %arg6[%c0_21, %c0_22], %30 {strides = array<i32>} : memref<16x128xf32, #tpu.memory_space<vmem>>, vector<16x128xf32>,
    } else {
    }
    %cst = arith.constant 0.000000e+00 : f32
    %3 = vector.broadcast %cst : f32 to vector<16x128xf32>
    %cst_1 = arith.constant 0xFF800000 : f32
    %4 = vector.broadcast %cst_1 : f32 to vector<16x128xf32>
    %c0_i32_2 = arith.constant 0 : i32
    %c128_i32 = arith.constant 128 : i32
    %5 = arith.muli %c0_i32_2, %c128_i32 : i32
    %6 = tpu.assume_multiple %5, 128 : i32
    %c0 = arith.constant 0 : index
    %c0_3 = arith.constant 0 : index
    %7 = arith.index_cast %6 : i32 to index
    %8 = vector.load %arg3[%c0, %c0_3, %7] : memref<1x16x256xf32, #tpu.memory_space<vmem>>, vector<1x16x128xf32>
    %9 = vector.shape_cast %8 : vector<1x16x128xf32> to vector<16x128xf32>
    %10 = arith.addf %3, %9 : vector<16x128xf32>
    %11 = arith.maximumf %4, %9 : vector<16x128xf32>
    %c1_i32 = arith.constant 1 : i32
    %c128_i32_4 = arith.constant 128 : i32
    %12 = arith.muli %c1_i32, %c128_i32_4 : i32
    %13 = tpu.assume_multiple %12, 128 : i32
    %c0_5 = arith.constant 0 : index
    %c0_6 = arith.constant 0 : index
    %14 = arith.index_cast %13 : i32 to index
    %15 = vector.load %arg3[%c0_5, %c0_6, %14] : memref<1x16x256xf32, #tpu.memory_space<vmem>>, vector<1x16x128xf32>
    %16 = vector.shape_cast %15 : vector<1x16x128xf32> to vector<16x128xf32>
    %17 = arith.addf %10, %16 : vector<16x128xf32>
    %18 = arith.maximumf %11, %16 : vector<16x128xf32>
    %c2_i32 = arith.constant 2 : i32
    %c0_7 = arith.constant 0 : index
    %c0_8 = arith.constant 0 : index
    %19 = vector.load %arg5[%c0_7, %c0_8] : memref<16x128xf32, #tpu.memory_space<vmem>>, vector<16x128xf32>
    %20 = arith.addf %19, %17 : vector<16x128xf32>
    %c0_9 = arith.constant 0 : index
    %c0_10 = arith.constant 0 : index
    %21 = vector.load %arg5[%c0_9, %c0_10] : memref<16x128xf32, #tpu.memory_space<vmem>>, vector<16x128xf32>
    tpu.vector_store %arg5[%c0_9, %c0_10], %20 {strides = array<i32>} : memref<16x128xf32, #tpu.memory_space<vmem>>, vector<16x128xf32>,
    %c0_11 = arith.constant 0 : index
    %c0_12 = arith.constant 0 : index
    %22 = vector.load %arg6[%c0_11, %c0_12] : memref<16x128xf32, #tpu.memory_space<vmem>>, vector<16x128xf32>
    %23 = arith.maximumf %22, %18 : vector<16x128xf32>
    %c0_13 = arith.constant 0 : index
    %c0_14 = arith.constant 0 : index
    %24 = vector.load %arg6[%c0_13, %c0_14] : memref<16x128xf32, #tpu.memory_space<vmem>>, vector<16x128xf32>
    tpu.vector_store %arg6[%c0_13, %c0_14], %23 {strides = array<i32>} : memref<16x128xf32, #tpu.memory_space<vmem>>, vector<16x128xf32>,
    %c0_i32_15 = arith.constant 0 : i32
    %25 = arith.cmpi eq, %arg2, %c0_i32_15 : i32
    %26 = arith.extui %25 : i1 to i32
    %c0_i32_16 = arith.constant 0 : i32
    %27 = arith.cmpi ne, %26, %c0_i32_16 : i32
    scf.if %27 {
      %c0_17 = arith.constant 0 : index
      %c0_18 = arith.constant 0 : index
      %28 = vector.load %arg5[%c0_17, %c0_18] : memref<16x128xf32, #tpu.memory_space<vmem>>, vector<16x128xf32>
      %cst_19 = arith.constant dense<0.000000e+00> : vector<16xf32>
      %29 = vector.multi_reduction <add>, %28, %cst_19 [1] : vector<16x128xf32> to vector<16xf32>
      %30 = vector.shape_cast %29 : vector<16xf32> to vector<16x1xf32>
      %cst_20 = arith.constant 3.906250e-03 : f32
      %31 = vector.broadcast %cst_20 : f32 to vector<16x1xf32>
      %32 = arith.mulf %30, %31 : vector<16x1xf32>
      %c0_21 = arith.constant 0 : index
      %c0_22 = arith.constant 0 : index
      %33 = vector.load %arg6[%c0_21, %c0_22] : memref<16x128xf32, #tpu.memory_space<vmem>>, vector<16x128xf32>
      %cst_23 = arith.constant dense<0xFF800000> : vector<16xf32>
      %34 = vector.multi_reduction <maximumf>, %33, %cst_23 [1] : vector<16x128xf32> to vector<16xf32>
      %35 = vector.shape_cast %34 : vector<16xf32> to vector<16x1xf32>
      %36 = tpu.concatenate %32, %35 in 1 : vector<16x1xf32>, vector<16x1xf32> -> vector<16x2xf32>
      %37 = tpu.transpose %36, [1, 0] : vector<16x2xf32> -> vector<2x16xf32>
      %c0_24 = arith.constant 0 : index
      %c0_25 = arith.constant 0 : index
      %c0_26 = arith.constant 0 : index
      %c0_27 = arith.constant 0 : index
      %38 = vector.load %arg4[%c0_24, %c0_25, %c0_26, %c0_27] : memref<1x1x2x16xf32, #tpu.memory_space<vmem>>, vector<1x1x2x16xf32>
      %39 = vector.shape_cast %38 : vector<1x1x2x16xf32> to vector<2x16xf32>
      %40 = vector.shape_cast %37 : vector<2x16xf32> to vector<1x1x2x16xf32>
      tpu.vector_store %arg4[%c0_24, %c0_25, %c0_26, %c0_27], %40 {strides = array<i32>} : memref<1x1x2x16xf32, #tpu.memory_space<vmem>>, vector<1x1x2x16xf32>,
    } else {
    }
    return
  }
  func.func @transform_0(%arg0: i32, %arg1: i32, %arg2: i32) -> (i32, i32, i32) {
    %c0_i32 = arith.constant 0 : i32
    return %arg0, %arg1, %arg2 : i32, i32, i32
  }
  func.func @transform_1(%arg0: i32, %arg1: i32, %arg2: i32) -> (i32, i32, i32, i32) {
    %c0_i32 = arith.constant 0 : i32
    %c0_i32_0 = arith.constant 0 : i32
    %c0_i32_1 = arith.constant 0 : i32
    return %arg0, %arg1, %c0_i32, %c0_i32_0 : i32, i32, i32, i32
  }
}

</mosaic_0001>

<bundles_post_ra>
// kernel: tpu_custom_call.1
= control target key start
LH: loop header
LB: loop body
LE: loop exit
PB: predicated region body
PF: predicated region fallthrough
CT: control target
= control target key end

     0   :  { %6 = vsyncpa [#allocation5], 0  ;;  %s687_s0 = inlined_call_operand.hbm [shape: f32[2,16,256], index: 0, kind: input, shape index: {}]   ;;  %s688_s1 = inlined_call_operand.hbm [shape: f32[2,1,2,16], index: 1, kind: output, shape index: {}]  }
   0x1   :  { %8 = vsyncpa [#allocation5 + $0x1], 0 }
   0x2   :  { %9 = vsyncpa [#allocation6], 0 }
   0x3   :  { %11 = vsyncpa [#allocation6 + $0x1], 0  ;;  %s566_s6 = smov 0   ;;  %s568_s7 = smov 0  }
   0x4   :  { %s570_s8 = smov 0   ;;  %s572_s9 = smov 0  }
   0x5   :  { %s574_s10 = smov 0   ;;  %s576_s11 = smov 0  }
   0x6 LB: > { %s358_s12 = sadd.s32 4294967295, %s552_s11   ;;  %s359_s13 = sadd.s32 4294967294, %s552_s11   ;;  %s552_s11 = sphi %s576_s11, %s17_s11   ;;  %s548_s10 = sphi %s574_s10, %s697_s10   ;;  %s544_s9 = sphi %s572_s9, %s696_s9   ;;  %s540_s8 = sphi %s570_s8, %s695_s8   ;;  %s536_s7 = sphi %s568_s7, %s694_s7   ;;  %s532_s6 = sphi %s566_s6, %s693_s6  }
   0x7   : > { %s36_s14 = sadd.s32 1, %s548_s10  ;;  %s47_s15 = sadd.s32 1, %s540_s8 }
   0x8   : > { %p38_p0 = scmp.ge.s32.totalorder %s36_s14, 2  ;;  %p54_p1 = scmp.ne.s32.totalorder %s540_s8, %s536_s7 }
   0x9   : > { %p55_p2 = scmp.eq.s32.totalorder %s552_s11, 0  ;;  %p60_p3 = scmp.ne.s32.totalorder %s536_s7, %s532_s6 }
   0xa   : > { %s699_s14 = smov (%p38_p0, %s36_s14), 0  ;;  %p61_p5 = scmp.eq.s32.totalorder %s358_s12, 0 }
   0xb   : > { %p607_p4 = por %p55_p2, %p54_p1  ;;  %s40_s17 = ssub.s32 %s548_s10, %s699_s14 }
   0xc   : > { %p86_p6 = scmp.eq.s32.totalorder %s358_s12, 1  ;;  %p45_p7 = scmp.eq.s32.totalorder %s40_s17, 0 }
   0xd   : > { %p613_p8 = por %p61_p5, %p60_p3  ;;  %p92_p10 = scmp.eq.s32.totalorder %s359_s13, 1 }
   0xe   : > { %p617_p9 = por %p86_p6, %p54_p1  ;;  %p361_p12 = scmp.ge.s32.totalorder %s552_s11, 2 }
   0xf   : > { %s622_s20 = scalar_select %p45_p7, %s540_s8, %s47_s15  }
  0x10   : > { %p624_p11 = por %p92_p10, %p60_p3  ;;  %p387_p13 = scmp.lt.s32.totalorder %s552_s11, 2 }
  0x11   : > { %s112_s22 = sand.u32 1, %s540_s8   ;;  %s374_s24 = sshll.u32 %s548_s10, 5 }
  0x12   : > { %s362_s23 = sshll.u32 %s112_s22, 5  ;;  %s126_s27 = scalar_lea.hbm %s687_s0, %s374_s24 }
  0x13   : > { %s116_s28 = scalar_lea.vmem [#allocation4], %s362_s23  ;;  %s127_s30 = sshll.u32 %s126_s27, 4  ;;  %s128_s30 = int_to_ptr.hbm [resolvable:$true] %s127_s30 }
  0x14   : > { %s129_s29 = sshll.u32 %s116_s28, 4  ;;  %p380_p0 = pnand %p387_p13, %p607_p4  ;;  %s130_s29 = int_to_ptr.vmem [resolvable:$true] %s129_s29 }
  0x15   : > { %p365_p1 = scmp.ge.s32.totalorder %s552_s11, 1  ;;  %s113_s2 = scalar_lea.sflag [#allocation5], %s112_s22 }
  0x16   : > { %s554_s3 = smov 256   ;;  %s555_s4 = smov 16  }
  0x17   : > { %382 = dma.hbm_to_vmem [thread:$0]  (!%p380_p0), %s128_s30, 512, %s130_s29, %s113_s2, %s554_s3, %s554_s3, %s555_s4  }
  0x18   : > { %p137_p2 = scmp.lt.s32.totalorder %s552_s11, 3 }
  0x1a   : > { %p138_p3 = pnand %p365_p1, %p137_p2 }
  0x1b   : > { %s640_s5 = sand.u32 (!%p138_p3), 1, %s536_s7  }
  0x1c   : > { %141 = sbr.rel (%p138_p3) target bundleno = 319 (0x13f), region = 24  ;;  %s366_s12 = sshll.u32 (!%p138_p3), %s640_s5, 5 }
  0x1d   : > { %s144_s13 = scalar_lea.sflag (!%p138_p3), [#allocation5], %s640_s5  ;;  %s147_s15 = scalar_lea.vmem (!%p138_p3), [#allocation4], %s366_s12 }
  0x21   : > { %523 = dma.done.wait (%p613_p8), %s144_s13, 512  }
  0x22   : > { %525 = vsyncadd (%p613_p8), %s144_s13, 4294966784  ;;  %v177_v0 = vld [vmem:[%s147_s15] sm:$0xff]  ;;  %v368_v1 = vld [vmem:[%s147_s15 + $0x8] sm:$0xff]  ;;  %vm217_vm0 = vcmask 7168   ;;  %s367_s16 = sshll.u32 %s640_s5, 1  ;;  %s371_s17 = sshll.u32 %s544_s9, 1 }
  0x23   : > { %v178_v2 = vld [vmem:[%s147_s15 + $0x10] sm:$0xff]  ;;  %v184_v3 = vadd.f32 %v368_v1, %v177_v0  ;;  %v369_v4 = vld [vmem:[%s147_s15 + $0x18] sm:$0xff]  ;;  %v186_v6 = vmax.f32 %v177_v0, %v368_v1  ;;  %s266_s23 = scalar_lea.hbm %s688_s1, %s371_s17  ;;  %s166_s24 = scalar_lea.vmem [#allocation7], %s367_s16  ;;  %vm252_vm1 = vcmask 123904  }
  0x24   : > { %v185_v5 = vadd.f32 %v369_v4, %v178_v2  ;;  %v187_v7 = vmax.f32 %v178_v2, %v369_v4  ;;  %s268_s25 = sshll.u32 %s166_s24, 4  ;;  %s270_s26 = sshll.u32 %s266_s23, 4  ;;  %s269_s25 = int_to_ptr.vmem [resolvable:$true] %s268_s25  ;;  %s271_s26 = int_to_ptr.hbm [resolvable:$true] %s270_s26 }
  0x25   : > { %205 = vadd.xlane.f32.xlu0 %v184_v3  ;;  %s255_s27 = scalar_lea.sflag [#allocation6], %s640_s5  ;;  %s484_s28 = sshra.s32 %s271_s26, 4  ;;  %s485_s28 = int_to_ptr.hbm [resolvable:$true] %s484_s28 }
  0x26   : > { %207 = vadd.xlane.f32.xlu1 %v185_v5  ;;  %s486_s29 = scalar_lea.hbm %s485_s28, 2  ;;  %s490_s2 = scalar_lea.hbm %s688_s1, 4 }
  0x27   : > { %p487_p4 = scmp.ne.s32.totalorder %s485_s28, %s486_s29  ;;  %p491_p7 = scmp.lt.s32.totalorder %s485_s28, %s688_s1 }
  0x28   : > { %p492_p8 = scmp.lt.s32.totalorder %s490_s2, %s486_s29 }
  0x29   : > { %p488_p5 = pnand %p487_p4, %p617_p9 }
  0x2a   : > { %p493_p10 = por %p492_p8, %p491_p7 }
  0x2b   : > { %p489_p6 = pneg %p488_p5 }
  0x2d   : > { %213 = vmax.xlane.f32.xlu0 %v186_v6  ;;  %p494_p13 = pnand %p493_p10, %p489_p6 }
  0x2e   : > { %215 = vmax.xlane.f32.xlu1 %v187_v7 }
  0x98   : > { %v206_v8 = vpop.xlane.xlu0 %205 }
  0x99   : > { %v208_v9 = vpop.xlane.xlu1 %207  ;;  %v209_v10 = vmul.f32 0.00390625, %v206_v8 }
  0x9a   : > { %v210_v13 = vmul.f32 0.00390625, %v208_v9 }
  0xa0   : > { %v214_v11 = vpop.xlane.xlu0 %213 }
  0xa1   : > { %v218_v12 = vsel %vm217_vm0, %v209_v10, %v214_v11  ;;  %v216_v14 = vpop.xlane.xlu1 %215 }
  0xa2   : > { %220 = vxpose.xlu2.b32.start [1/2] (short) (narrow) %v218_v12, 8  ;;  %v219_v15 = vsel %vm217_vm0, %v210_v13, %v216_v14 }
  0xaa   : > { %221 = vxpose.xlu2.b32.end [2/2] (short) (narrow) %v219_v15, 8 }
 0x13b   : > { %v236_v16 = vpop.trf.xlu2 }
 0x13c   : > { %253 = vst.msk [vmem:[%s166_s24] sm:$0x3] %vm252_vm1, %v236_v16 }
 0x13d   : > { %497 = shalt.err (!%p494_p13)
}
 0x13e   : > { %377 = dma.vmem_to_hbm [thread:$0]  (%p617_p9), %s269_s25, 32, %s271_s26, %s255_s27  }
 0x13f PF: > { %s282_s5 = sand.u32 1, %s532_s6   ;;  %p384_p0 = pnand %p361_p12, %p624_p11 }
 0x140   : > { %s283_s12 = scalar_lea.sflag [#allocation6], %s282_s5 }
 0x141   : > { %p385_p1 = pneg %p384_p0 }
 0x143   : > { %527 = dma.done.wait (%p385_p1), %s283_s12, 32  }
 0x144   : > { %529 = vsyncadd (%p385_p1), %s283_s12, 4294967264  ;;  %s17_s11 = sadd.s32 1, %s552_s11   ;;  %s693_s6 = smov %s536_s7 }
 0x145   : > { %p14_p2 = scmp.ge.s32.totalorder %s17_s11, 4   ;;  %s694_s7 = smov %s540_s8 }
 0x146   : > { %s695_s8 = smov %s622_s20  ;;  %s696_s9 = smov %s548_s10 }
 0x147   : > { %s697_s10 = smov %s699_s14  ;;  %16 = sbr.rel (!%p14_p2) target bundleno = 6 (0x6), region = 78 }
 0x14c   :  { %289 = vsyncpa [#allocation5], 1 }
 0x14d   :  { %291 = vsyncpa [#allocation5 + $0x1], 1 }
 0x14e   :  { %292 = vsyncpa [#allocation6], 1 }
 0x14f   :  { %294 = vsyncpa [#allocation6 + $0x1], 1 }

</bundles_post_ra>
